<compile_context>
chip_gen: v7x
topology: tpu7x:2x2x1
jax: 0.10.0
libtpu: 0.0.40
codegen_flags: <defaults>
</compile_context>

<pallas_src>
import functools

import jax
import jax.numpy as jnp
from jax.experimental import pallas as pl
from jax.experimental.pallas import tpu as pltpu


def _label_smooth_kernel(label_ref, pred_ref, loss_ref, *,
                         label_smooth_val, avg_smooth_val, num_rows):
    """Per-tile smoothed-NLL partial sum.

    label_ref: (TILE_N, 1) int32 class ids           (VMEM)
    pred_ref : (TILE_N, C) logits, any float dtype   (VMEM)
    loss_ref : (1, 8, 128) f32; only [0, 0, 0] holds this tile's partial sum
    """
    pred = pred_ref[...].astype(jnp.float32)               # (TILE_N, C)
    tn, c = pred.shape

    # Numerically stable row statistics (EUP exp/log, XLU lane reductions).
    m = jnp.max(pred, axis=1, keepdims=True)                # (TILE_N, 1)
    shifted = pred - m
    lse = jnp.log(jnp.sum(jnp.exp(shifted), axis=1, keepdims=True))

    # Fused weighted reduction:
    #   w_c = eps/C + (1 - eps) * [c == y_i]
    #   sum_c w_c * shifted_c == (1-eps)*(pred[y]-m) + (eps/C)*sum_c(pred-m)
    # One select + one lane reduction instead of a gather plus a second reduce.
    col = jax.lax.broadcasted_iota(jnp.int32, (1, c), 1)    # (1, C) lane ids
    lab = label_ref[...]                                    # (TILE_N, 1)
    off = jnp.float32(avg_smooth_val)
    on = jnp.float32(1.0 - label_smooth_val + avg_smooth_val)
    w = jnp.where(col == lab, on, off)                      # broadcast (TILE_N, C)
    weighted = jnp.sum(w * shifted, axis=1, keepdims=True)  # (TILE_N, 1)

    # Sum of the smoothed one-hot row (== 1.0 when C == num_classes).
    lse_coef = jnp.float32(1.0 - label_smooth_val + avg_smooth_val * c)
    per_row = lse_coef * lse - weighted                     # (TILE_N, 1)

    # Mask rows past N in the (possibly partial) last tile: padded rows can
    # hold garbage logits (Inf/NaN after exp) and we now reduce in-kernel.
    row = (jax.lax.broadcasted_iota(jnp.int32, (tn, 1), 0)
           + pl.program_id(0) * tn)
    per_row = jnp.where(row < num_rows, per_row, 0.0)

    total = jnp.sum(per_row)                                # scalar partial

    # Lane-dense, (8,128)-aligned output block: one unmasked vst per tile.
    r = jax.lax.broadcasted_iota(jnp.int32, (8, 128), 0)
    l = jax.lax.broadcasted_iota(jnp.int32, (8, 128), 1)
    blk = jnp.where((r + l) == 0, total, 0.0)
    loss_ref[...] = blk[None, :, :]


def _pick_tile_n(n, c, itemsize, target_bytes=2 << 20):
    """Rows per tile.

    * tiny problems (<= 1 MiB of logits): a single block (grid=(1,)); the
      per-step + launch overhead would dominate anything finer.
    * otherwise: ~target_bytes of logits per tile (near the measured 85%+
      of-HBM-roofline knee), multiple of 8 sublanes, capped so the grid has
      >= 2 (prefer 4) tiles so the "parallel" axis can shard across v7x's TCs.
    """
    total_bytes = n * c * itemsize
    if n <= 8 or total_bytes <= (1 << 20):
        return int(n)
    rows = max(8, (target_bytes // max(1, c * itemsize)) // 8 * 8)
    want_tiles = 4 if n >= 32 else 2
    cap = max(8, (pl.cdiv(n, want_tiles) + 7) // 8 * 8)
    return int(min(rows, cap))


def _reduce_loss(loss, reduction):
    if reduction == 'none':
        return loss
    if reduction == 'mean':
        return jnp.mean(loss)
    if reduction == 'sum':
        return jnp.sum(loss)
    raise ValueError(f'unknown reduction {reduction!r}')


def _weight_reduce_loss(loss, weight=None, reduction='mean', avg_factor=None):
    # Mirrors mmcls.weight_reduce_loss.  As in the PyTorch reference, `loss`
    # is already a scalar here, so `weight` broadcasts against a scalar.
    if weight is not None:
        loss = loss * jnp.asarray(weight, jnp.float32)
    if avg_factor is None:
        loss = _reduce_loss(loss, reduction)
    else:
        if reduction == 'mean':
            loss = jnp.sum(loss) / jnp.float32(avg_factor)
        elif reduction != 'none':
            raise ValueError('avg_factor can not be used with reduction="sum"')
    return loss


class LabelSmoothLoss:
    """JAX/Pallas equivalent of the PyTorch LabelSmoothLoss module."""

    def __init__(self, label_smooth_val, num_classes, reduction='mean',
                 loss_weight=1.0):
        self.label_smooth_val = float(label_smooth_val)
        self.num_classes = int(num_classes)
        self.avg_smooth_val = self.label_smooth_val / self.num_classes
        self.reduction = reduction
        self.loss_weight = float(loss_weight)

    def _partial_sums(self, cls_score, label):
        n, c = cls_score.shape
        itemsize = jnp.dtype(cls_score.dtype).itemsize
        tile_n = _pick_tile_n(n, c, itemsize)
        num_tiles = pl.cdiv(n, tile_n)

        kernel = functools.partial(
            _label_smooth_kernel,
            label_smooth_val=self.label_smooth_val,
            avg_smooth_val=self.avg_smooth_val,
            num_rows=n,
        )

        # VMEM budget for the f32 WORKING SET, not just the input block:
        # double-buffered input tiles + ~4 f32 tile-sized temporaries
        # (f32 pred, shifted, exp, weights) + small per-row vectors.
        # Capped at 48 MiB so it fits v7x's 64 MiB physical VMEM with headroom
        # (v5e/v6e have 128 MiB, so the cap is safe everywhere).
        in_block = tile_n * c * itemsize
        f32_block = tile_n * c * 4
        working = 2 * in_block + 4 * f32_block + 16 * tile_n + (2 << 20)
        vmem_limit = int(min(48 << 20, max(16 << 20, working)))

        partials = pl.pallas_call(
            kernel,
            out_shape=jax.ShapeDtypeStruct((num_tiles, 8, 128), jnp.float32),
            grid=(num_tiles,),
            in_specs=[
                pl.BlockSpec((tile_n, 1), lambda i: (i, 0)),   # labels
                # NOTE: if a v7x profile shows exposed DMA at tile boundaries,
                # add pipeline_mode=pl.Buffered(3) here (and grow vmem_limit).
                pl.BlockSpec((tile_n, c), lambda i: (i, 0)),   # logits
            ],
            out_specs=pl.BlockSpec((1, 8, 128), lambda i: (i, 0, 0)),
            compiler_params=pltpu.CompilerParams(
                dimension_semantics=("parallel",),
                vmem_limit_bytes=vmem_limit,
            ),
        )(label.reshape(-1, 1).astype(jnp.int32), cls_score)
        return partials

    def __call__(self, cls_score, label, weight=None, avg_factor=None,
                 reduction_override=None):
        assert reduction_override in (None, 'none', 'mean', 'sum')
        reduction = reduction_override if reduction_override else self.reduction

        # The PyTorch reference reduces with torch.sum to a scalar BEFORE
        # weight_reduce_loss; replicate that exactly.  Only [i, 0, 0] of each
        # per-tile block is nonzero, so summing the whole tiny buffer is exact.
        loss = jnp.sum(self._partial_sums(cls_score, label))
        loss = _weight_reduce_loss(loss, weight=weight, reduction=reduction,
                                   avg_factor=avg_factor)
        return self.loss_weight * loss


def _reference(cls_score, label, label_smooth_val, avg_smooth_val,
               loss_weight=1.0):
    logp = jax.nn.log_softmax(cls_score.astype(jnp.float32), axis=1)
    n, c = cls_score.shape
    one_hot = jnp.full((n, c), avg_smooth_val, jnp.float32)
    one_hot = one_hot.at[jnp.arange(n), label].set(
        1.0 - label_smooth_val + avg_smooth_val)
    return loss_weight * (-jnp.sum(logp * one_hot))


if __name__ == "__main__":
    key = jax.random.PRNGKey(0)
    k1, k2, k3, k4 = jax.random.split(key, 4)

    # 1) Small leaf-disease-like config: single-block path, batch not a
    #    multiple of the 8-row sublane tile.
    batch, num_classes = 20, 32
    cls_score = jax.random.normal(k1, (batch, num_classes), dtype=jnp.float32)
    label = jax.random.randint(k2, (batch,), 0, num_classes, dtype=jnp.int32)

    module = LabelSmoothLoss(label_smooth_val=0.1, num_classes=num_classes,
                             reduction='mean', loss_weight=1.0)

    loss = jax.block_until_ready(module(cls_score, label))
    ref = _reference(cls_score, label, 0.1, 0.1 / num_classes)
    assert jnp.allclose(loss, ref, rtol=1e-5, atol=1e-3), (loss, ref)

    # 2) bf16 HBM-resident logits (halves read traffic), avg_factor path.
    loss_bf16 = jax.block_until_ready(
        module(cls_score.astype(jnp.bfloat16), label, avg_factor=batch))
    ref_bf16 = _reference(cls_score.astype(jnp.bfloat16), label,
                          0.1, 0.1 / num_classes) / batch
    assert jnp.allclose(loss_bf16, ref_bf16, rtol=1e-4, atol=1e-4), (
        loss_bf16, ref_bf16)

    # 3) Multi-tile path: >= 4 tiles ("parallel" megacore sharding), partial
    #    last tile -> in-kernel row masking + per-tile partial sums.
    n2, c2 = 600, 512
    logits2 = jax.random.normal(k3, (n2, c2), dtype=jnp.float32)
    labels2 = jax.random.randint(k4, (n2,), 0, c2, dtype=jnp.int32)
    module2 = LabelSmoothLoss(label_smooth_val=0.1, num_classes=c2,
                              reduction='mean', loss_weight=2.0)
    loss2 = jax.block_until_ready(module2(logits2, labels2))
    ref2 = _reference(logits2, labels2, 0.1, 0.1 / c2, loss_weight=2.0)
    assert jnp.allclose(loss2, ref2, rtol=1e-4, atol=1e-2), (loss2, ref2)

    print("KERNEL_OK")
</pallas_src>

<mosaic_0001>
module attributes {stable_mosaic.version = 11 : i64} {
  func.func @_label_smooth_kernel(%arg0: i32, %arg1: memref<20x1xi32, #tpu.memory_space<vmem>>, %arg2: memref<20x32xf32, #tpu.memory_space<vmem>>, %arg3: memref<1x8x128xf32, #tpu.memory_space<vmem>>) attributes {dimension_semantics = [#tpu.dimension_semantics<parallel>], iteration_bounds = array<i64: 1>, scalar_prefetch = 0 : i64, scratch_operands = 0 : i64, tpu.core_type = #tpu.core_type<tc>, window_params = [{transform_indices = @transform_0, window_bounds = array<i64: 20, 1>}, {transform_indices = @transform_1, window_bounds = array<i64: 20, 32>}, {transform_indices = @transform_2, window_bounds = array<i64: 1, 8, 128>}]} {
    %c0 = arith.constant 0 : index
    %c0_0 = arith.constant 0 : index
    %0 = vector.load %arg2[%c0, %c0_0] : memref<20x32xf32, #tpu.memory_space<vmem>>, vector<20x32xf32>
    %cst = arith.constant dense<0xFF800000> : vector<20xf32>
    %1 = vector.multi_reduction <maximumf>, %0, %cst [1] : vector<20x32xf32> to vector<20xf32>
    %2 = vector.shape_cast %1 : vector<20xf32> to vector<20x1xf32>
    %3 = vector.broadcast %2 : vector<20x1xf32> to vector<20x32xf32>
    %4 = arith.subf %0, %3 : vector<20x32xf32>
    %5 = math.exp %4 : vector<20x32xf32>
    %cst_1 = arith.constant dense<0.000000e+00> : vector<20xf32>
    %6 = vector.multi_reduction <add>, %5, %cst_1 [1] : vector<20x32xf32> to vector<20xf32>
    %7 = vector.shape_cast %6 : vector<20xf32> to vector<20x1xf32>
    %8 = math.log %7 : vector<20x1xf32>
    %9 = tpu.iota {dimensions = array<i32: 1>} : vector<1x32xi32>
    %c0_2 = arith.constant 0 : index
    %c0_3 = arith.constant 0 : index
    %10 = vector.load %arg1[%c0_2, %c0_3] : memref<20x1xi32, #tpu.memory_space<vmem>>, vector<20x1xi32>
    %11 = vector.broadcast %9 : vector<1x32xi32> to vector<20x32xi32>
    %12 = vector.broadcast %10 : vector<20x1xi32> to vector<20x32xi32>
    %13 = arith.cmpi eq, %11, %12 : vector<20x32xi32>
    %cst_4 = arith.constant 0.903124988 : f32
    %cst_5 = arith.constant 3.125000e-03 : f32
    %14 = vector.broadcast %cst_4 : f32 to vector<20x32xf32>
    %15 = vector.broadcast %cst_5 : f32 to vector<20x32xf32>
    %16 = arith.select %13, %14, %15 : vector<20x32xi1>, vector<20x32xf32>
    %17 = arith.mulf %16, %4 : vector<20x32xf32>
    %cst_6 = arith.constant dense<0.000000e+00> : vector<20xf32>
    %18 = vector.multi_reduction <add>, %17, %cst_6 [1] : vector<20x32xf32> to vector<20xf32>
    %19 = vector.shape_cast %18 : vector<20xf32> to vector<20x1xf32>
    %cst_7 = arith.constant 1.000000e+00 : f32
    %20 = vector.broadcast %cst_7 : f32 to vector<20x1xf32>
    %21 = arith.mulf %20, %8 : vector<20x1xf32>
    %22 = arith.subf %21, %19 : vector<20x1xf32>
    %23 = tpu.iota {dimensions = array<i32: 0>} : vector<20x1xi32>
    %c20_i32 = arith.constant 20 : i32
    %24 = arith.muli %arg0, %c20_i32 : i32
    %25 = vector.broadcast %24 : i32 to vector<20x1xi32>
    %26 = arith.addi %23, %25 : vector<20x1xi32>
    %c20_i32_8 = arith.constant 20 : i32
    %27 = vector.broadcast %c20_i32_8 : i32 to vector<20x1xi32>
    %28 = arith.cmpi slt, %26, %27 : vector<20x1xi32>
    %cst_9 = arith.constant 0.000000e+00 : f32
    %29 = vector.broadcast %cst_9 : f32 to vector<20x1xf32>
    %30 = arith.select %28, %22, %29 : vector<20x1xi1>, vector<20x1xf32>
    %31 = vector.shape_cast %30 : vector<20x1xf32> to vector<1x20x1xf32>
    %cst_10 = arith.constant dense<0.000000e+00> : vector<1xf32>
    %32 = vector.multi_reduction <add>, %31, %cst_10 [1, 2] : vector<1x20x1xf32> to vector<1xf32>
    %33 = vector.shape_cast %32 : vector<1xf32> to vector<1x1x1xf32>
    %34 = vector.extract %33[0, 0, 0] : f32 from vector<1x1x1xf32>
    %35 = tpu.iota {dimensions = array<i32: 0>} : vector<8x128xi32>
    %36 = tpu.iota {dimensions = array<i32: 1>} : vector<8x128xi32>
    %37 = arith.addi %35, %36 : vector<8x128xi32>
    %c0_i32 = arith.constant 0 : i32
    %38 = vector.broadcast %c0_i32 : i32 to vector<8x128xi32>
    %39 = arith.cmpi eq, %37, %38 : vector<8x128xi32>
    %cst_11 = arith.constant 0.000000e+00 : f32
    %40 = vector.broadcast %34 : f32 to vector<8x128xf32>
    %41 = vector.broadcast %cst_11 : f32 to vector<8x128xf32>
    %42 = arith.select %39, %40, %41 : vector<8x128xi1>, vector<8x128xf32>
    %43 = vector.shape_cast %42 : vector<8x128xf32> to vector<1x8x128xf32>
    %c0_12 = arith.constant 0 : index
    %c0_13 = arith.constant 0 : index
    %c0_14 = arith.constant 0 : index
    %44 = vector.load %arg3[%c0_12, %c0_13, %c0_14] : memref<1x8x128xf32, #tpu.memory_space<vmem>>, vector<1x8x128xf32>
    tpu.vector_store %arg3[%c0_12, %c0_13, %c0_14], %43 {strides = array<i32>} : memref<1x8x128xf32, #tpu.memory_space<vmem>>, vector<1x8x128xf32>,
    return
  }
  func.func @transform_0(%arg0: i32) -> (i32, i32) {
    %c0_i32 = arith.constant 0 : i32
    %c0_i32_0 = arith.constant 0 : i32
    return %arg0, %c0_i32 : i32, i32
  }
  func.func @transform_1(%arg0: i32) -> (i32, i32) {
    %c0_i32 = arith.constant 0 : i32
    %c0_i32_0 = arith.constant 0 : i32
    return %arg0, %c0_i32 : i32, i32
  }
  func.func @transform_2(%arg0: i32) -> (i32, i32, i32) {
    %c0_i32 = arith.constant 0 : i32
    %c0_i32_0 = arith.constant 0 : i32
    %c0_i32_1 = arith.constant 0 : i32
    return %arg0, %c0_i32, %c0_i32_0 : i32, i32, i32
  }
}

</mosaic_0001>

<bundles_post_ra>
// kernel: tpu_custom_call.1
= control target key start
LH: loop header
LB: loop body
LE: loop exit
PB: predicated region body
PF: predicated region fallthrough
CT: control target
= control target key end

     0   :  { %vm22_vm0 = vcmask 257024   ;;  %vm15_vm1 = vcmask 261120   ;;  %s241_s0 = inlined_call_operand.vmem [shape: s32[20,1], index: 0, kind: input, shape index: {}]   ;;  %s242_s1 = inlined_call_operand.vmem [shape: f32[20,32], index: 1, kind: input, shape index: {}]   ;;  %s243_s2 = inlined_call_operand.hbm [shape: f32[1,8,128], index: 2, kind: output, shape index: {}]  }
   0x1   :  { %v14_v0 = vld [vmem:[%s242_s1 + $0x10] sm:$0xf]  ;;  %v12_v1 = vld [vmem:[%s242_s1] sm:$0xff]  ;;  %v13_v2 = vld [vmem:[%s242_s1 + $0x8] sm:$0xff] }
   0x2   :  { %v23_v3 = vsel %vm22_vm0, %v14_v0, -inf  ;;  %v16_v4 = vsel %vm15_vm1, %v12_v1, -inf }
   0x3   :  { %24 = vmax.xlane.f32.xlu1 %v23_v3  ;;  %17 = vmax.xlane.f32.xlu0 %v16_v4 }
   0x4   :  { %7 = vsyncpa [#allocation3], 0  ;;  %v19_v5 = vsel %vm15_vm1, %v13_v2, -inf  ;;  %v178_v6 = vmov 0   ;;  %v52_v7 = vld [vmem:[%s241_s0] sm:$0xff]  ;;  %v53_v9 = vld [vmem:[%s241_s0 + $0x8] sm:$0xff]  ;;  %v50_v18 = vlaneseq }
   0x5   :  { %140 = vset.pattern.permute.xlu1 %v178_v6  ;;  %141 = vset.pattern.permute.xlu0 %v178_v6  ;;  %v54_v8 = vld [vmem:[%s241_s0 + $0x10] sm:$0xf]  ;;  %v179_v26 = vmov 0.003125   ;;  %vm100_vm5 = vcmask 7168   ;;  %vm104_vm7 = vcmask 3072  }
   0x6   :  { %v217_v20 = vand.u32 127, %v50_v18  ;;  %v86_v44 = vshrl.u32 %v50_v18, 7  ;;  %s180_s0 = smov [#allocation2]  }
   0x7   :  { %20 = vmax.xlane.f32.xlu0 %v19_v5  ;;  %s127_s20 = sshll.u32 %s180_s0, 4  ;;  %s128_s20 = int_to_ptr.vmem [resolvable:$true] %s127_s20 }
   0x8   :  { %v88_v48 = vadd.s32 16, %v86_v44  ;;  %v116_v6 = vadd.s32 %v86_v44, %v217_v20  ;;  %s154_s22 = scalar_lea.vmem %s128_s20, 128  ;;  %p159_p1 = scmp.lt.s32.totalorder %s128_s20, %s128_s20 }
   0x9   :  { %p155_p0 = scmp.ne.s32.totalorder %s128_s20, %s154_s22  ;;  %p160_p2 = scmp.lt.s32.totalorder %s154_s22, %s154_s22 }
   0xa   :  { %vm96_vm6 = vcmp.lt.s32.totalorder %v88_v48, 20  ;;  %vm117_vm8 = vcmp.eq.s32.totalorder %v116_v6, 0 }
   0xb   :  { %p161_p3 = por %p160_p2, %p159_p1 }
   0xd   :  { %p162_p4 = pnand %p161_p3, %p155_p0 }
  0x14   :  { %56 = vperm.xlu1 %140, %v52_v7  }
  0x18   :  { %62 = vperm.xlu1 %140, %v54_v8  }
  0x1d   :  { %59 = vperm.xlu0 %141, %v53_v9  }
  0x90   :  { %v25_v10 = vpop.xlane.xlu1 %24  ;;  %v18_v11 = vpop.xlane.xlu0 %17 }
  0x91   :  { %v28_v12 = vsub.f32 %v14_v0, %v25_v10  ;;  %v26_v13 = vsub.f32 %v12_v1, %v18_v11 }
  0x93   :  { %v33_v14 = vmul.f32 1.442695, %v28_v12  ;;  %v29_v15 = vmul.f32 1.442695, %v26_v13 }
  0x94   :  { %v21_v16 = vpop.xlane.xlu0 %20  ;;  %v57_v21 = vpop.permute.xlu1 %56 }
  0x95   :  { %142 = vpow2.f32 %v33_v14  ;;  %v27_v17 = vsub.f32 %v13_v2, %v21_v16  ;;  %vm64_vm2 = vcmp.eq.s32.totalorder %v217_v20, %v57_v21 }
  0x96   :  { %144 = vpow2.f32 %v29_v15  ;;  %v67_v27 = vsel %vm64_vm2, 0.903125, %v179_v26 }
  0x97   :  { %v31_v19 = vmul.f32 1.442695, %v27_v17  ;;  %v70_v32 = vmul.f32 %v67_v27, %v26_v13 }
  0x98   :  { %v63_v30 = vpop.permute.xlu1 %62 }
  0x99   :  { %146 = vpow2.f32 %v31_v19  ;;  %vm66_vm4 = vcmp.eq.s32.totalorder %v217_v20, %v63_v30  ;;  %v73_v34 = vsel %vm15_vm1, %v70_v32, 0.0 }
  0x9a   :  { %v69_v36 = vsel %vm66_vm4, 0.903125, %v179_v26 }
  0x9b   :  { %v72_v38 = vmul.f32 %v69_v36, %v28_v12 }
  0x9c   :  { %v60_v24 = vpop.permute.xlu0 %59 }
  0x9d   :  { %vm65_vm3 = vcmp.eq.s32.totalorder %v217_v20, %v60_v24  ;;  %v79_v39 = vsel %vm22_vm0, %v72_v38, 0.0 }
  0x9e   :  { %v68_v33 = vsel %vm65_vm3, 0.903125, %v179_v26 }
  0x9f   :  { %v143_v22 = vpop.eup %142  ;;  %v71_v35 = vmul.f32 %v68_v33, %v27_v17 }
  0xa0   :  { %v145_v23 = vpop.eup %144  ;;  %v41_v29 = vsel %vm22_vm0, %v143_v22, 0.0 }
  0xa1   :  { %v35_v25 = vsel %vm15_vm1, %v145_v23, 0.0  ;;  %v76_v37 = vsel %vm15_vm1, %v71_v35, 0.0 }
  0xa2   :  { %36 = vadd.xlane.f32.xlu1 %v35_v25 }
  0xa3   :  { %v147_v28 = vpop.eup %146 }
  0xa4   :  { %v38_v31 = vsel %vm15_vm1, %v147_v28, 0.0 }
  0xa5   :  { %39 = vadd.xlane.f32.xlu0 %v38_v31 }
  0xa6   :  { %42 = vadd.xlane.f32.xlu1 %v41_v29 }
  0xaa   :  { %74 = vadd.xlane.f32.xlu1 %v73_v34 }
  0xae   :  { %77 = vadd.xlane.f32.xlu1 %v76_v37 }
  0xb2   :  { %80 = vadd.xlane.f32.xlu1 %v79_v39 }
 0x12f   :  { %v37_v40 = vpop.xlane.xlu1 %36 }
 0x130   :  { %148 = vlog2.f32 %v37_v40 }
 0x132   :  { %v40_v41 = vpop.xlane.xlu0 %39 }
 0x133   :  { %v43_v42 = vpop.xlane.xlu1 %42  ;;  %150 = vlog2.f32 %v40_v41 }
 0x134   :  { %152 = vlog2.f32 %v43_v42 }
 0x137   :  { %v75_v43 = vpop.xlane.xlu1 %74 }
 0x13a   :  { %v149_v45 = vpop.eup %148 }
 0x13b   :  { %v45_v46 = vmul.f32 0.6931472, %v149_v45  ;;  %v78_v47 = vpop.xlane.xlu1 %77 }
 0x13d   :  { %v151_v49 = vpop.eup %150  ;;  %v82_v51 = vsub.f32 %v45_v46, %v75_v43 }
 0x13e   :  { %v153_v50 = vpop.eup %152  ;;  %v47_v52 = vmul.f32 0.6931472, %v151_v49 }
 0x13f   :  { %v49_v53 = vmul.f32 0.6931472, %v153_v50  ;;  %v81_v54 = vpop.xlane.xlu1 %80  ;;  %v101_v57 = vsel %vm100_vm5, %v82_v51, 0.0 }
 0x140   :  { %v83_v55 = vsub.f32 %v47_v52, %v78_v47 }
 0x141   :  { %v84_v56 = vsub.f32 %v49_v53, %v81_v54 }
 0x142   :  { %v102_v58 = vsel %vm100_vm5, %v83_v55, 0.0 }
 0x143   :  { %v99_v59 = vsel %vm96_vm6, %v84_v56, 0.0  ;;  %v103_v60 = vadd.f32 %v102_v58, %v101_v57 }
 0x144   :  { %v105_v61 = vsel %vm104_vm7, %v99_v59, 0.0 }
 0x145   :  { %v106_v62 = vadd.f32 %v105_v61, %v103_v60 }
 0x147   :  { %107 = vadd.xlane.f32.xlu1 %v106_v62 }
 0x1d4   :  { %v108_v63 = vpop.xlane.xlu1 %107 }
 0x1d5   :  { %v109_v0 = vrot.slane %v108_v63, 4 }
 0x1d7   :  { %v110_v1 = vadd.f32 %v109_v0, %v108_v63 }
 0x1d9   :  { %v111_v2 = vrot.slane %v110_v1, 2 }
 0x1db   :  { %v112_v3 = vadd.f32 %v111_v2, %v110_v1 }
 0x1dd   :  { %v113_v4 = vrot.slane %v112_v3, 1 }
 0x1df   :  { %v114_v5 = vadd.f32 %v113_v4, %v112_v3 }
 0x1e1   :  { %135 = vpush %v114_v5 }
 0x212   :  { %s136_s21 = spop %135 }
 0x213   :  { %v118_v7 = vstv %s136_s21 }
 0x214   :  { %v119_v8 = vsel %vm117_vm8, %v118_v7, 0.0 }
 0x215   :  { %120 = vst [vmem:[#allocation2] sm:$0xff] %v119_v8 }
 0x216   :  { %165 = shalt.err (!%p162_p4)
}
 0x217   :  { %s166_s25 = scalar_lea.hbm %s243_s2, 128 }
 0x218   :  { %p167_p5 = scmp.ne.s32.totalorder %s243_s2, %s166_s25  ;;  %p170_p6 = scmp.lt.u32.totalorder %s166_s25, %s243_s2 }
 0x21a   :  { %p172_p7 = pnand %p170_p6, %p167_p5 }
 0x21c   :  { %175 = shalt.err (!%p172_p7)
}
 0x21d   :  { %130 = dma.vmem_to_hbm [thread:$0]  %s128_s20, 128, %s243_s2, [#allocation3]  }
 0x21e   :  { %176 = dma.done.wait [#allocation3], 128  }
 0x21f   :  { %177 = vsyncadd [#allocation3], 4294967168 }
 0x220   :  { %134 = vsyncpa [#allocation3], 1 }

</bundles_post_ra>
